<compile_context>
chip_gen: v7x
topology: tpu7x:2x2x1
jax: 0.10.0
libtpu: 0.0.40
codegen_flags: <defaults>
</compile_context>

<pallas_src>
import functools
import math

import jax
import jax.numpy as jnp
from jax import lax
from jax.experimental import pallas as pl
from jax.experimental.pallas import tpu as pltpu

# ALPHA is an (undefined) module-level global in the PyTorch source; fix it here.
ALPHA = 0.5
EPS = 1e-8
LANE = 128
SUB = 8  # sublanes per vreg


def _ccl_stats_kernel(x_ref, y_ref,
                      osx, osy, osxy, osxx, osyy, osdd,
                      sx, sy, sxy, sxx, syy, sdd,
                      *, batch, tile_r, r_total, tiles_per_core):
    """Streaming per-batch sufficient statistics.

    x_ref / y_ref : (B, tile_r, 128) tile of the flattened inputs (input dtype).
    osx..osdd     : (1, B, 1) per-core outputs (sum_x, sum_y, sum_xy, sum_xx,
                    sum_yy, sum_sqdiff), written once in the finalize.
    sx..sdd       : (B, 8, 128) f32 accumulators, resident across the tile axis.
    """
    c = pl.program_id(0)   # core / parallel axis
    j = pl.program_id(1)   # tile axis (sequential per core)

    @pl.when(j == 0)
    def _init():
        z = jnp.zeros((batch, SUB, LANE), jnp.float32)
        sx[...] = z
        sy[...] = z
        sxy[...] = z
        sxx[...] = z
        syy[...] = z
        sdd[...] = z

    # Nominal (unclamped) tile index drives the validity mask.  The input
    # index_map clamps to the last tile so the DMA never walks off the array;
    # fully out-of-range tiles are masked to zero below.
    tile_row0 = (c * tiles_per_core + j) * tile_r

    nsub = tile_r // SUB
    # Hoisted row-index iota (sub-block relative), full shape so the select
    # below never needs a minor-dim broadcast.
    row_iota = lax.broadcasted_iota(jnp.int32, (batch, SUB, LANE), 1)

    def body(i, carry):
        px, py, pxy, pxx, pyy, pdd = carry
        r0 = pl.multiple_of(i * SUB, SUB)
        xs = x_ref[:, pl.ds(r0, SUB), :].astype(jnp.float32)   # (B, 8, 128)
        ys = y_ref[:, pl.ds(r0, SUB), :].astype(jnp.float32)
        # Rows at/after r_total hold pipeline garbage (could be NaN/Inf):
        # select, never multiply.
        valid = row_iota < (r_total - (tile_row0 + i * SUB))
        xs = jnp.where(valid, xs, 0.0)
        ys = jnp.where(valid, ys, 0.0)
        d = xs - ys
        return (px + xs, py + ys, pxy + xs * ys, pxx + xs * xs,
                pyy + ys * ys, pdd + d * d)

    zero = jnp.zeros((batch, SUB, LANE), jnp.float32)
    init = (zero, zero, zero, zero, zero, zero)
    # TODO(synk): for large B (> ~4) split the carry per batch row so the live
    # vreg count (6*B partials + inputs) stays well under 64.
    px, py, pxy, pxx, pyy, pdd = lax.fori_loop(
        0, nsub, body, init, unroll=math.gcd(nsub, 8))

    # One small accumulator read-modify-write per tile (6*B vregs each way),
    # instead of six full-tile RMWs per tile.
    sx[...] += px
    sy[...] += py
    sxy[...] += pxy
    sxx[...] += pxx
    syy[...] += pyy
    sdd[...] += pdd

    @pl.when(j == pl.num_programs(1) - 1)
    def _finalize():
        def _reduce(acc_ref):                              # (B, 8, 128) -> (B, 1)
            sub = jnp.sum(acc_ref[...], axis=1)            # sublane reduce -> (B, 128)
            return jnp.sum(sub, axis=1, keepdims=True)     # lane reduce    -> (B, 1)

        osx[0] = _reduce(sx)
        osy[0] = _reduce(sy)
        osxy[0] = _reduce(sxy)
        osxx[0] = _reduce(sxx)
        osyy[0] = _reduce(syy)
        osdd[0] = _reduce(sdd)


def _vmem_capacity_bytes():
    try:
        return int(pltpu.get_tpu_info().vmem_capacity_bytes)
    except Exception:
        return 64 * 1024 * 1024   # conservative (v7x per-TC physical VMEM)


def _default_tile_r(batch, dtype, vmem_cap):
    """Largest sublane tile such that the 2 inputs x 2 pipeline buffers fit in a
    ~40% slice of this generation's VMEM (accumulators are tile-size independent
    now, so only the double-buffered input blocks matter)."""
    itemsize = jnp.dtype(dtype).itemsize
    budget = min(int(vmem_cap * 0.4), 48 * 1024 * 1024)
    bytes_per_row = 2 * 2 * batch * LANE * itemsize
    tile = budget // max(bytes_per_row, 1)
    cap = 2048 if vmem_cap >= (96 << 20) else 1024        # 128 MiB chips vs v7x
    tile = int(max(SUB, min(tile, cap)))
    return (tile // SUB) * SUB


def combined_correlation_loss(pred, target, *, tile_r=None):
    """pred, target: arrays of identical shape (e.g. NCHW). Returns f32 scalar."""
    assert pred.shape == target.shape, (pred.shape, target.shape)
    batch = pred.shape[0]
    x = pred.reshape(batch, -1)
    y = target.reshape(batch, -1)
    n_true = x.shape[1]

    # Lane-tail pad only: zero-pad the flattened axis to whole 128-lane rows
    # (and at least 8 rows) so the (B, R, 128) reshape is layout-free.  Zeros
    # are neutral to every statistic; the true N drives the divisions.
    # TODO(synk): fold the sub-128 tail into the in-kernel mask too so unaligned
    # N needs no pad copy at all.
    pad = (-n_true) % LANE
    r_total = (n_true + pad) // LANE
    if r_total < SUB:
        pad += (SUB - r_total) * LANE
        r_total = SUB
    if pad:
        x = jnp.pad(x, ((0, 0), (0, pad)))
        y = jnp.pad(y, ((0, 0), (0, pad)))

    x3 = x.reshape(batch, r_total, LANE)
    y3 = y.reshape(batch, r_total, LANE)
    itemsize = jnp.dtype(x3.dtype).itemsize

    vmem_cap = _vmem_capacity_bytes()
    if tile_r is None:
        tile_r = _default_tile_r(batch, x3.dtype, vmem_cap)
    # Multiple of 8, no larger than the array; the last (partial) tile is
    # handled by the in-kernel row mask instead of a wrapper-side pad.
    tile_r = max(SUB, (min(int(tile_r), r_total) // SUB) * SUB)
    num_tiles = -(-r_total // tile_r)

    # Split the tile axis across the (up to) two TensorCores; on 1-TC chips the
    # "parallel" axis simply serializes with negligible overhead.
    ncores = 2 if num_tiles >= 2 else 1
    tiles_per_core = -(-num_tiles // ncores)

    def in_map(c, j):
        # Clamp so the DMA never reads past the array; fully out-of-range tiles
        # contribute zero via the in-kernel mask.
        return (0, jnp.minimum(c * tiles_per_core + j, num_tiles - 1), 0)

    kernel = functools.partial(
        _ccl_stats_kernel, batch=batch, tile_r=tile_r, r_total=r_total,
        tiles_per_core=tiles_per_core)

    stat_shape = jax.ShapeDtypeStruct((ncores, batch, 1), jnp.float32)
    stat_spec = pl.BlockSpec((1, batch, 1), lambda c, j: (c, 0, 0))

    block_bytes = batch * tile_r * LANE * itemsize
    need = 4 * block_bytes + 6 * batch * SUB * LANE * 4 + (1 << 20)
    vmem_limit = int(min(vmem_cap * 3 // 4, max(32 * 1024 * 1024, 2 * need)))

    outs = pl.pallas_call(
        kernel,
        out_shape=(stat_shape,) * 6,
        grid_spec=pltpu.PrefetchScalarGridSpec(
            num_scalar_prefetch=0,
            grid=(ncores, tiles_per_core),
            in_specs=[
                pl.BlockSpec((batch, tile_r, LANE), in_map),
                pl.BlockSpec((batch, tile_r, LANE), in_map),
            ],
            out_specs=(stat_spec,) * 6,
            scratch_shapes=[
                pltpu.VMEM((batch, SUB, LANE), jnp.float32) for _ in range(6)
            ],
        ),
        compiler_params=pltpu.CompilerParams(
            # Core-split axis is parallel; the tile/reduction axis carries the
            # resident accumulators and per-core outputs -> arbitrary.
            dimension_semantics=("parallel", "arbitrary"),
            vmem_limit_bytes=vmem_limit,
        ),
        cost_estimate=pl.CostEstimate(
            flops=11 * x3.size,
            transcendentals=0,
            bytes_accessed=2 * x3.size * itemsize + 6 * ncores * batch * 4,
        ),
    )(x3, y3)

    # Combine per-core partial statistics and run the (negligible) scalar
    # Pearson / MSE epilogue in plain JAX.
    sum_x, sum_y, sum_xy, sum_xx, sum_yy, sum_dd = [
        jnp.sum(o[:, :, 0], axis=0) for o in outs]          # each (B,)

    inv_n = 1.0 / float(n_true)
    # Raw-moment formulas (f32 accumulation).  TODO(synk): add first-tile
    # centering / Kahan if inputs can have |mean| >> std (cancellation risk).
    num = sum_xy - sum_x * sum_y * inv_n
    var_x = jnp.maximum(sum_xx - sum_x * sum_x * inv_n, 0.0)
    var_y = jnp.maximum(sum_yy - sum_y * sum_y * inv_n, 0.0)
    denom = jnp.sqrt(var_x) * jnp.sqrt(var_y) + EPS          # reference EPS placement
    corr = jnp.mean(num / denom)
    mse = jnp.sum(sum_dd) * ((1.0 / float(batch)) * inv_n)
    corr_loss = 1.0 - corr
    corr_loss = jnp.where(corr_loss < EPS, 0.0, corr_loss)
    return ALPHA * 10.0 * corr_loss + (1.0 - ALPHA) * mse


def _reference_loss(pred, target):
    """Pure-JAX reference mirroring the PyTorch forward exactly (two-pass)."""
    B = pred.shape[0]
    x = pred.reshape(B, -1).astype(jnp.float32)
    y = target.reshape(B, -1).astype(jnp.float32)
    mse = jnp.mean((x - y) ** 2)
    xc = x - x.mean(axis=1, keepdims=True)
    yc = y - y.mean(axis=1, keepdims=True)
    num = jnp.sum(xc * yc, axis=1)
    xn = jnp.sqrt(jnp.sum(xc ** 2, axis=1))
    yn = jnp.sqrt(jnp.sum(yc ** 2, axis=1))
    corr = jnp.mean(num / (xn * yn + EPS))
    corr_loss = 1.0 - corr
    corr_loss = jnp.where(corr_loss < EPS, 0.0, corr_loss)
    return ALPHA * 10.0 * corr_loss + (1.0 - ALPHA) * mse


def _check(name, shape, seed, tile_r=None, rtol=2e-4, atol=2e-4):
    k1, k2 = jax.random.split(jax.random.PRNGKey(seed))
    pred = jax.random.normal(k1, shape, dtype=jnp.float32)
    target = jax.random.normal(k2, shape, dtype=jnp.float32)
    loss = combined_correlation_loss(pred, target, tile_r=tile_r)
    jax.block_until_ready(loss)
    ref = _reference_loss(pred, target)
    assert jnp.allclose(loss, ref, rtol=rtol, atol=atol), (name, loss, ref)


if __name__ == "__main__":
    # 1. Canonical small NCHW shape: N multiple of 128, single tile, one core.
    _check("basic", (2, 4, 16, 16), 0)
    # 2. Multi-tile streaming path (forced tile_r=8): r_total=32 -> grid (2, 2),
    #    exercises init / accumulate-across-tiles / finalize on both cores.
    _check("stream", (2, 4, 16, 64), 1, tile_r=8)
    # 3. Partial last tile: r_total=10, tile_r=8 -> 6 garbage rows that must be
    #    masked in-kernel (no wrapper pad).
    _check("partial_tile", (2, 4, 16, 20), 2)
    # 4. Odd tile count: r_total=24, tile_r=8 -> 3 tiles over 2 cores; core 1's
    #    second tile is fully out of range (clamped DMA index + all-rows mask).
    _check("odd_tiles", (2, 4, 16, 48), 3, tile_r=8)
    # 5. N not a multiple of 128 and fewer than 8 rows (lane-tail zero pad +
    #    minimum-rows bump).
    _check("lane_tail", (2, 3, 10, 11), 4)
    print("KERNEL_OK")
</pallas_src>

<mosaic_0001>
module attributes {stable_mosaic.version = 11 : i64} {
  func.func @_ccl_stats_kernel(%arg0: i32, %arg1: i32, %arg2: memref<2x8x128xf32, #tpu.memory_space<vmem>>, %arg3: memref<2x8x128xf32, #tpu.memory_space<vmem>>, %arg4: memref<1x2x1xf32, #tpu.memory_space<vmem>>, %arg5: memref<1x2x1xf32, #tpu.memory_space<vmem>>, %arg6: memref<1x2x1xf32, #tpu.memory_space<vmem>>, %arg7: memref<1x2x1xf32, #tpu.memory_space<vmem>>, %arg8: memref<1x2x1xf32, #tpu.memory_space<vmem>>, %arg9: memref<1x2x1xf32, #tpu.memory_space<vmem>>, %arg10: memref<2x8x128xf32, #tpu.memory_space<vmem>>, %arg11: memref<2x8x128xf32, #tpu.memory_space<vmem>>, %arg12: memref<2x8x128xf32, #tpu.memory_space<vmem>>, %arg13: memref<2x8x128xf32, #tpu.memory_space<vmem>>, %arg14: memref<2x8x128xf32, #tpu.memory_space<vmem>>, %arg15: memref<2x8x128xf32, #tpu.memory_space<vmem>>) attributes {dimension_semantics = [#tpu.dimension_semantics<parallel>, #tpu.dimension_semantics<arbitrary>], iteration_bounds = array<i64: 1, 1>, scalar_prefetch = 0 : i64, scratch_operands = 6 : i64, tpu.core_type = #tpu.core_type<tc>, window_params = [{transform_indices = @transform_0, window_bounds = array<i64: 2, 8, 128>}, {transform_indices = @transform_1, window_bounds = array<i64: 2, 8, 128>}, {transform_indices = @transform_2, window_bounds = array<i64: 1, 2, 1>}, {transform_indices = @transform_3, window_bounds = array<i64: 1, 2, 1>}, {transform_indices = @transform_4, window_bounds = array<i64: 1, 2, 1>}, {transform_indices = @transform_5, window_bounds = array<i64: 1, 2, 1>}, {transform_indices = @transform_6, window_bounds = array<i64: 1, 2, 1>}, {transform_indices = @transform_7, window_bounds = array<i64: 1, 2, 1>}]} {
    %c0_i32 = arith.constant 0 : i32
    %0 = arith.cmpi eq, %arg1, %c0_i32 : i32
    %1 = arith.extui %0 : i1 to i32
    %c0_i32_0 = arith.constant 0 : i32
    %2 = arith.cmpi ne, %1, %c0_i32_0 : i32
    scf.if %2 {
      %cst_49 = arith.constant 0.000000e+00 : f32
      %55 = vector.broadcast %cst_49 : f32 to vector<2x8x128xf32>
      %c0_50 = arith.constant 0 : index
      %c0_51 = arith.constant 0 : index
      %c0_52 = arith.constant 0 : index
      %56 = vector.load %arg10[%c0_50, %c0_51, %c0_52] : memref<2x8x128xf32, #tpu.memory_space<vmem>>, vector<2x8x128xf32>
      tpu.vector_store %arg10[%c0_50, %c0_51, %c0_52], %55 {strides = array<i32>} : memref<2x8x128xf32, #tpu.memory_space<vmem>>, vector<2x8x128xf32>,
      %c0_53 = arith.constant 0 : index
      %c0_54 = arith.constant 0 : index
      %c0_55 = arith.constant 0 : index
      %57 = vector.load %arg11[%c0_53, %c0_54, %c0_55] : memref<2x8x128xf32, #tpu.memory_space<vmem>>, vector<2x8x128xf32>
      tpu.vector_store %arg11[%c0_53, %c0_54, %c0_55], %55 {strides = array<i32>} : memref<2x8x128xf32, #tpu.memory_space<vmem>>, vector<2x8x128xf32>,
      %c0_56 = arith.constant 0 : index
      %c0_57 = arith.constant 0 : index
      %c0_58 = arith.constant 0 : index
      %58 = vector.load %arg12[%c0_56, %c0_57, %c0_58] : memref<2x8x128xf32, #tpu.memory_space<vmem>>, vector<2x8x128xf32>
      tpu.vector_store %arg12[%c0_56, %c0_57, %c0_58], %55 {strides = array<i32>} : memref<2x8x128xf32, #tpu.memory_space<vmem>>, vector<2x8x128xf32>,
      %c0_59 = arith.constant 0 : index
      %c0_60 = arith.constant 0 : index
      %c0_61 = arith.constant 0 : index
      %59 = vector.load %arg13[%c0_59, %c0_60, %c0_61] : memref<2x8x128xf32, #tpu.memory_space<vmem>>, vector<2x8x128xf32>
      tpu.vector_store %arg13[%c0_59, %c0_60, %c0_61], %55 {strides = array<i32>} : memref<2x8x128xf32, #tpu.memory_space<vmem>>, vector<2x8x128xf32>,
      %c0_62 = arith.constant 0 : index
      %c0_63 = arith.constant 0 : index
      %c0_64 = arith.constant 0 : index
      %60 = vector.load %arg14[%c0_62, %c0_63, %c0_64] : memref<2x8x128xf32, #tpu.memory_space<vmem>>, vector<2x8x128xf32>
      tpu.vector_store %arg14[%c0_62, %c0_63, %c0_64], %55 {strides = array<i32>} : memref<2x8x128xf32, #tpu.memory_space<vmem>>, vector<2x8x128xf32>,
      %c0_65 = arith.constant 0 : index
      %c0_66 = arith.constant 0 : index
      %c0_67 = arith.constant 0 : index
      %61 = vector.load %arg15[%c0_65, %c0_66, %c0_67] : memref<2x8x128xf32, #tpu.memory_space<vmem>>, vector<2x8x128xf32>
      tpu.vector_store %arg15[%c0_65, %c0_66, %c0_67], %55 {strides = array<i32>} : memref<2x8x128xf32, #tpu.memory_space<vmem>>, vector<2x8x128xf32>,
    } else {
    }
    %c1_i32 = arith.constant 1 : i32
    %3 = arith.muli %arg0, %c1_i32 : i32
    %4 = arith.addi %3, %arg1 : i32
    %c8_i32 = arith.constant 8 : i32
    %5 = arith.muli %4, %c8_i32 : i32
    %6 = tpu.iota {dimensions = array<i32: 1>} : vector<2x8x128xi32>
    %cst = arith.constant 0.000000e+00 : f32
    %7 = vector.broadcast %cst : f32 to vector<2x8x128xf32>
    %c0_i32_1 = arith.constant 0 : i32
    %c8_i32_2 = arith.constant 8 : i32
    %8 = arith.muli %c0_i32_1, %c8_i32_2 : i32
    %9 = tpu.assume_multiple %8, 8 : i32
    %c0 = arith.constant 0 : index
    %10 = arith.index_cast %9 : i32 to index
    %c0_3 = arith.constant 0 : index
    %11 = vector.load %arg2[%c0, %10, %c0_3] : memref<2x8x128xf32, #tpu.memory_space<vmem>>, vector<2x8x128xf32>
    %c0_4 = arith.constant 0 : index
    %12 = arith.index_cast %9 : i32 to index
    %c0_5 = arith.constant 0 : index
    %13 = vector.load %arg3[%c0_4, %12, %c0_5] : memref<2x8x128xf32, #tpu.memory_space<vmem>>, vector<2x8x128xf32>
    %c8_i32_6 = arith.constant 8 : i32
    %14 = arith.muli %c0_i32_1, %c8_i32_6 : i32
    %15 = arith.addi %5, %14 : i32
    %c8_i32_7 = arith.constant 8 : i32
    %16 = arith.subi %c8_i32_7, %15 : i32
    %17 = vector.broadcast %16 : i32 to vector<2x8x128xi32>
    %18 = arith.cmpi slt, %6, %17 : vector<2x8x128xi32>
    %cst_8 = arith.constant 0.000000e+00 : f32
    %19 = vector.broadcast %cst_8 : f32 to vector<2x8x128xf32>
    %20 = arith.select %18, %11, %19 : vector<2x8x128xi1>, vector<2x8x128xf32>
    %cst_9 = arith.constant 0.000000e+00 : f32
    %21 = vector.broadcast %cst_9 : f32 to vector<2x8x128xf32>
    %22 = arith.select %18, %13, %21 : vector<2x8x128xi1>, vector<2x8x128xf32>
    %23 = arith.subf %20, %22 : vector<2x8x128xf32>
    %24 = arith.addf %7, %20 : vector<2x8x128xf32>
    %25 = arith.addf %7, %22 : vector<2x8x128xf32>
    %26 = arith.mulf %20, %22 : vector<2x8x128xf32>
    %27 = arith.addf %7, %26 : vector<2x8x128xf32>
    %28 = arith.mulf %20, %20 : vector<2x8x128xf32>
    %29 = arith.addf %7, %28 : vector<2x8x128xf32>
    %30 = arith.mulf %22, %22 : vector<2x8x128xf32>
    %31 = arith.addf %7, %30 : vector<2x8x128xf32>
    %32 = arith.mulf %23, %23 : vector<2x8x128xf32>
    %33 = arith.addf %7, %32 : vector<2x8x128xf32>
    %c1_i32_10 = arith.constant 1 : i32
    %c0_11 = arith.constant 0 : index
    %c0_12 = arith.constant 0 : index
    %c0_13 = arith.constant 0 : index
    %34 = vector.load %arg10[%c0_11, %c0_12, %c0_13] : memref<2x8x128xf32, #tpu.memory_space<vmem>>, vector<2x8x128xf32>
    %35 = arith.addf %34, %24 : vector<2x8x128xf32>
    %c0_14 = arith.constant 0 : index
    %c0_15 = arith.constant 0 : index
    %c0_16 = arith.constant 0 : index
    %36 = vector.load %arg10[%c0_14, %c0_15, %c0_16] : memref<2x8x128xf32, #tpu.memory_space<vmem>>, vector<2x8x128xf32>
    tpu.vector_store %arg10[%c0_14, %c0_15, %c0_16], %35 {strides = array<i32>} : memref<2x8x128xf32, #tpu.memory_space<vmem>>, vector<2x8x128xf32>,
    %c0_17 = arith.constant 0 : index
    %c0_18 = arith.constant 0 : index
    %c0_19 = arith.constant 0 : index
    %37 = vector.load %arg11[%c0_17, %c0_18, %c0_19] : memref<2x8x128xf32, #tpu.memory_space<vmem>>, vector<2x8x128xf32>
    %38 = arith.addf %37, %25 : vector<2x8x128xf32>
    %c0_20 = arith.constant 0 : index
    %c0_21 = arith.constant 0 : index
    %c0_22 = arith.constant 0 : index
    %39 = vector.load %arg11[%c0_20, %c0_21, %c0_22] : memref<2x8x128xf32, #tpu.memory_space<vmem>>, vector<2x8x128xf32>
    tpu.vector_store %arg11[%c0_20, %c0_21, %c0_22], %38 {strides = array<i32>} : memref<2x8x128xf32, #tpu.memory_space<vmem>>, vector<2x8x128xf32>,
    %c0_23 = arith.constant 0 : index
    %c0_24 = arith.constant 0 : index
    %c0_25 = arith.constant 0 : index
    %40 = vector.load %arg12[%c0_23, %c0_24, %c0_25] : memref<2x8x128xf32, #tpu.memory_space<vmem>>, vector<2x8x128xf32>
    %41 = arith.addf %40, %27 : vector<2x8x128xf32>
    %c0_26 = arith.constant 0 : index
    %c0_27 = arith.constant 0 : index
    %c0_28 = arith.constant 0 : index
    %42 = vector.load %arg12[%c0_26, %c0_27, %c0_28] : memref<2x8x128xf32, #tpu.memory_space<vmem>>, vector<2x8x128xf32>
    tpu.vector_store %arg12[%c0_26, %c0_27, %c0_28], %41 {strides = array<i32>} : memref<2x8x128xf32, #tpu.memory_space<vmem>>, vector<2x8x128xf32>,
    %c0_29 = arith.constant 0 : index
    %c0_30 = arith.constant 0 : index
    %c0_31 = arith.constant 0 : index
    %43 = vector.load %arg13[%c0_29, %c0_30, %c0_31] : memref<2x8x128xf32, #tpu.memory_space<vmem>>, vector<2x8x128xf32>
    %44 = arith.addf %43, %29 : vector<2x8x128xf32>
    %c0_32 = arith.constant 0 : index
    %c0_33 = arith.constant 0 : index
    %c0_34 = arith.constant 0 : index
    %45 = vector.load %arg13[%c0_32, %c0_33, %c0_34] : memref<2x8x128xf32, #tpu.memory_space<vmem>>, vector<2x8x128xf32>
    tpu.vector_store %arg13[%c0_32, %c0_33, %c0_34], %44 {strides = array<i32>} : memref<2x8x128xf32, #tpu.memory_space<vmem>>, vector<2x8x128xf32>,
    %c0_35 = arith.constant 0 : index
    %c0_36 = arith.constant 0 : index
    %c0_37 = arith.constant 0 : index
    %46 = vector.load %arg14[%c0_35, %c0_36, %c0_37] : memref<2x8x128xf32, #tpu.memory_space<vmem>>, vector<2x8x128xf32>
    %47 = arith.addf %46, %31 : vector<2x8x128xf32>
    %c0_38 = arith.constant 0 : index
    %c0_39 = arith.constant 0 : index
    %c0_40 = arith.constant 0 : index
    %48 = vector.load %arg14[%c0_38, %c0_39, %c0_40] : memref<2x8x128xf32, #tpu.memory_space<vmem>>, vector<2x8x128xf32>
    tpu.vector_store %arg14[%c0_38, %c0_39, %c0_40], %47 {strides = array<i32>} : memref<2x8x128xf32, #tpu.memory_space<vmem>>, vector<2x8x128xf32>,
    %c0_41 = arith.constant 0 : index
    %c0_42 = arith.constant 0 : index
    %c0_43 = arith.constant 0 : index
    %49 = vector.load %arg15[%c0_41, %c0_42, %c0_43] : memref<2x8x128xf32, #tpu.memory_space<vmem>>, vector<2x8x128xf32>
    %50 = arith.addf %49, %33 : vector<2x8x128xf32>
    %c0_44 = arith.constant 0 : index
    %c0_45 = arith.constant 0 : index
    %c0_46 = arith.constant 0 : index
    %51 = vector.load %arg15[%c0_44, %c0_45, %c0_46] : memref<2x8x128xf32, #tpu.memory_space<vmem>>, vector<2x8x128xf32>
    tpu.vector_store %arg15[%c0_44, %c0_45, %c0_46], %50 {strides = array<i32>} : memref<2x8x128xf32, #tpu.memory_space<vmem>>, vector<2x8x128xf32>,
    %c0_i32_47 = arith.constant 0 : i32
    %52 = arith.cmpi eq, %arg1, %c0_i32_47 : i32
    %53 = arith.extui %52 : i1 to i32
    %c0_i32_48 = arith.constant 0 : i32
    %54 = arith.cmpi ne, %53, %c0_i32_48 : i32
    scf.if %54 {
      %c0_49 = arith.constant 0 : index
      %c0_50 = arith.constant 0 : index
      %c0_51 = arith.constant 0 : index
      %55 = vector.load %arg10[%c0_49, %c0_50, %c0_51] : memref<2x8x128xf32, #tpu.memory_space<vmem>>, vector<2x8x128xf32>
      %cst_52 = arith.constant dense<0.000000e+00> : vector<2x128xf32>
      %56 = vector.multi_reduction <add>, %55, %cst_52 [1] : vector<2x8x128xf32> to vector<2x128xf32>
      %cst_53 = arith.constant dense<0.000000e+00> : vector<2xf32>
      %57 = vector.multi_reduction <add>, %56, %cst_53 [1] : vector<2x128xf32> to vector<2xf32>
      %58 = vector.shape_cast %57 : vector<2xf32> to vector<2x1xf32>
      %c0_54 = arith.constant 0 : index
      %c0_55 = arith.constant 0 : index
      %c0_56 = arith.constant 0 : index
      %59 = vector.load %arg4[%c0_54, %c0_55, %c0_56] : memref<1x2x1xf32, #tpu.memory_space<vmem>>, vector<1x2x1xf32>
      %60 = vector.shape_cast %59 : vector<1x2x1xf32> to vector<2x1xf32>
      %61 = vector.shape_cast %58 : vector<2x1xf32> to vector<1x2x1xf32>
      tpu.vector_store %arg4[%c0_54, %c0_55, %c0_56], %61 {strides = array<i32>} : memref<1x2x1xf32, #tpu.memory_space<vmem>>, vector<1x2x1xf32>,
      %c0_57 = arith.constant 0 : index
      %c0_58 = arith.constant 0 : index
      %c0_59 = arith.constant 0 : index
      %62 = vector.load %arg11[%c0_57, %c0_58, %c0_59] : memref<2x8x128xf32, #tpu.memory_space<vmem>>, vector<2x8x128xf32>
      %cst_60 = arith.constant dense<0.000000e+00> : vector<2x128xf32>
      %63 = vector.multi_reduction <add>, %62, %cst_60 [1] : vector<2x8x128xf32> to vector<2x128xf32>
      %cst_61 = arith.constant dense<0.000000e+00> : vector<2xf32>
      %64 = vector.multi_reduction <add>, %63, %cst_61 [1] : vector<2x128xf32> to vector<2xf32>
      %65 = vector.shape_cast %64 : vector<2xf32> to vector<2x1xf32>
      %c0_62 = arith.constant 0 : index
      %c0_63 = arith.constant 0 : index
      %c0_64 = arith.constant 0 : index
      %66 = vector.load %arg5[%c0_62, %c0_63, %c0_64] : memref<1x2x1xf32, #tpu.memory_space<vmem>>, vector<1x2x1xf32>
      %67 = vector.shape_cast %66 : vector<1x2x1xf32> to vector<2x1xf32>
      %68 = vector.shape_cast %65 : vector<2x1xf32> to vector<1x2x1xf32>
      tpu.vector_store %arg5[%c0_62, %c0_63, %c0_64], %68 {strides = array<i32>} : memref<1x2x1xf32, #tpu.memory_space<vmem>>, vector<1x2x1xf32>,
      %c0_65 = arith.constant 0 : index
      %c0_66 = arith.constant 0 : index
      %c0_67 = arith.constant 0 : index
      %69 = vector.load %arg12[%c0_65, %c0_66, %c0_67] : memref<2x8x128xf32, #tpu.memory_space<vmem>>, vector<2x8x128xf32>
      %cst_68 = arith.constant dense<0.000000e+00> : vector<2x128xf32>
      %70 = vector.multi_reduction <add>, %69, %cst_68 [1] : vector<2x8x128xf32> to vector<2x128xf32>
      %cst_69 = arith.constant dense<0.000000e+00> : vector<2xf32>
      %71 = vector.multi_reduction <add>, %70, %cst_69 [1] : vector<2x128xf32> to vector<2xf32>
      %72 = vector.shape_cast %71 : vector<2xf32> to vector<2x1xf32>
      %c0_70 = arith.constant 0 : index
      %c0_71 = arith.constant 0 : index
      %c0_72 = arith.constant 0 : index
      %73 = vector.load %arg6[%c0_70, %c0_71, %c0_72] : memref<1x2x1xf32, #tpu.memory_space<vmem>>, vector<1x2x1xf32>
      %74 = vector.shape_cast %73 : vector<1x2x1xf32> to vector<2x1xf32>
      %75 = vector.shape_cast %72 : vector<2x1xf32> to vector<1x2x1xf32>
      tpu.vector_store %arg6[%c0_70, %c0_71, %c0_72], %75 {strides = array<i32>} : memref<1x2x1xf32, #tpu.memory_space<vmem>>, vector<1x2x1xf32>,
      %c0_73 = arith.constant 0 : index
      %c0_74 = arith.constant 0 : index
      %c0_75 = arith.constant 0 : index
      %76 = vector.load %arg13[%c0_73, %c0_74, %c0_75] : memref<2x8x128xf32, #tpu.memory_space<vmem>>, vector<2x8x128xf32>
      %cst_76 = arith.constant dense<0.000000e+00> : vector<2x128xf32>
      %77 = vector.multi_reduction <add>, %76, %cst_76 [1] : vector<2x8x128xf32> to vector<2x128xf32>
      %cst_77 = arith.constant dense<0.000000e+00> : vector<2xf32>
      %78 = vector.multi_reduction <add>, %77, %cst_77 [1] : vector<2x128xf32> to vector<2xf32>
      %79 = vector.shape_cast %78 : vector<2xf32> to vector<2x1xf32>
      %c0_78 = arith.constant 0 : index
      %c0_79 = arith.constant 0 : index
      %c0_80 = arith.constant 0 : index
      %80 = vector.load %arg7[%c0_78, %c0_79, %c0_80] : memref<1x2x1xf32, #tpu.memory_space<vmem>>, vector<1x2x1xf32>
      %81 = vector.shape_cast %80 : vector<1x2x1xf32> to vector<2x1xf32>
      %82 = vector.shape_cast %79 : vector<2x1xf32> to vector<1x2x1xf32>
      tpu.vector_store %arg7[%c0_78, %c0_79, %c0_80], %82 {strides = array<i32>} : memref<1x2x1xf32, #tpu.memory_space<vmem>>, vector<1x2x1xf32>,
      %c0_81 = arith.constant 0 : index
      %c0_82 = arith.constant 0 : index
      %c0_83 = arith.constant 0 : index
      %83 = vector.load %arg14[%c0_81, %c0_82, %c0_83] : memref<2x8x128xf32, #tpu.memory_space<vmem>>, vector<2x8x128xf32>
      %cst_84 = arith.constant dense<0.000000e+00> : vector<2x128xf32>
      %84 = vector.multi_reduction <add>, %83, %cst_84 [1] : vector<2x8x128xf32> to vector<2x128xf32>
      %cst_85 = arith.constant dense<0.000000e+00> : vector<2xf32>
      %85 = vector.multi_reduction <add>, %84, %cst_85 [1] : vector<2x128xf32> to vector<2xf32>
      %86 = vector.shape_cast %85 : vector<2xf32> to vector<2x1xf32>
      %c0_86 = arith.constant 0 : index
      %c0_87 = arith.constant 0 : index
      %c0_88 = arith.constant 0 : index
      %87 = vector.load %arg8[%c0_86, %c0_87, %c0_88] : memref<1x2x1xf32, #tpu.memory_space<vmem>>, vector<1x2x1xf32>
      %88 = vector.shape_cast %87 : vector<1x2x1xf32> to vector<2x1xf32>
      %89 = vector.shape_cast %86 : vector<2x1xf32> to vector<1x2x1xf32>
      tpu.vector_store %arg8[%c0_86, %c0_87, %c0_88], %89 {strides = array<i32>} : memref<1x2x1xf32, #tpu.memory_space<vmem>>, vector<1x2x1xf32>,
      %c0_89 = arith.constant 0 : index
      %c0_90 = arith.constant 0 : index
      %c0_91 = arith.constant 0 : index
      %90 = vector.load %arg15[%c0_89, %c0_90, %c0_91] : memref<2x8x128xf32, #tpu.memory_space<vmem>>, vector<2x8x128xf32>
      %cst_92 = arith.constant dense<0.000000e+00> : vector<2x128xf32>
      %91 = vector.multi_reduction <add>, %90, %cst_92 [1] : vector<2x8x128xf32> to vector<2x128xf32>
      %cst_93 = arith.constant dense<0.000000e+00> : vector<2xf32>
      %92 = vector.multi_reduction <add>, %91, %cst_93 [1] : vector<2x128xf32> to vector<2xf32>
      %93 = vector.shape_cast %92 : vector<2xf32> to vector<2x1xf32>
      %c0_94 = arith.constant 0 : index
      %c0_95 = arith.constant 0 : index
      %c0_96 = arith.constant 0 : index
      %94 = vector.load %arg9[%c0_94, %c0_95, %c0_96] : memref<1x2x1xf32, #tpu.memory_space<vmem>>, vector<1x2x1xf32>
      %95 = vector.shape_cast %94 : vector<1x2x1xf32> to vector<2x1xf32>
      %96 = vector.shape_cast %93 : vector<2x1xf32> to vector<1x2x1xf32>
      tpu.vector_store %arg9[%c0_94, %c0_95, %c0_96], %96 {strides = array<i32>} : memref<1x2x1xf32, #tpu.memory_space<vmem>>, vector<1x2x1xf32>,
    } else {
    }
    return
  }
  func.func @transform_0(%arg0: i32, %arg1: i32) -> (i32, i32, i32) {
    %c1_i32 = arith.constant 1 : i32
    %0 = arith.muli %arg0, %c1_i32 : i32
    %1 = arith.addi %0, %arg1 : i32
    %c0_i32 = arith.constant 0 : i32
    %2 = arith.minsi %1, %c0_i32 : i32
    %c0_i32_0 = arith.constant 0 : i32
    %c0_i32_1 = arith.constant 0 : i32
    %c0_i32_2 = arith.constant 0 : i32
    return %c0_i32_0, %2, %c0_i32_1 : i32, i32, i32
  }
  func.func @transform_1(%arg0: i32, %arg1: i32) -> (i32, i32, i32) {
    %c1_i32 = arith.constant 1 : i32
    %0 = arith.muli %arg0, %c1_i32 : i32
    %1 = arith.addi %0, %arg1 : i32
    %c0_i32 = arith.constant 0 : i32
    %2 = arith.minsi %1, %c0_i32 : i32
    %c0_i32_0 = arith.constant 0 : i32
    %c0_i32_1 = arith.constant 0 : i32
    %c0_i32_2 = arith.constant 0 : i32
    return %c0_i32_0, %2, %c0_i32_1 : i32, i32, i32
  }
  func.func @transform_2(%arg0: i32, %arg1: i32) -> (i32, i32, i32) {
    %c0_i32 = arith.constant 0 : i32
    %c0_i32_0 = arith.constant 0 : i32
    %c0_i32_1 = arith.constant 0 : i32
    return %arg0, %c0_i32, %c0_i32_0 : i32, i32, i32
  }
  func.func @transform_3(%arg0: i32, %arg1: i32) -> (i32, i32, i32) {
    %c0_i32 = arith.constant 0 : i32
    %c0_i32_0 = arith.constant 0 : i32
    %c0_i32_1 = arith.constant 0 : i32
    return %arg0, %c0_i32, %c0_i32_0 : i32, i32, i32
  }
  func.func @transform_4(%arg0: i32, %arg1: i32) -> (i32, i32, i32) {
    %c0_i32 = arith.constant 0 : i32
    %c0_i32_0 = arith.constant 0 : i32
    %c0_i32_1 = arith.constant 0 : i32
    return %arg0, %c0_i32, %c0_i32_0 : i32, i32, i32
  }
  func.func @transform_5(%arg0: i32, %arg1: i32) -> (i32, i32, i32) {
    %c0_i32 = arith.constant 0 : i32
    %c0_i32_0 = arith.constant 0 : i32
    %c0_i32_1 = arith.constant 0 : i32
    return %arg0, %c0_i32, %c0_i32_0 : i32, i32, i32
  }
  func.func @transform_6(%arg0: i32, %arg1: i32) -> (i32, i32, i32) {
    %c0_i32 = arith.constant 0 : i32
    %c0_i32_0 = arith.constant 0 : i32
    %c0_i32_1 = arith.constant 0 : i32
    return %arg0, %c0_i32, %c0_i32_0 : i32, i32, i32
  }
  func.func @transform_7(%arg0: i32, %arg1: i32) -> (i32, i32, i32) {
    %c0_i32 = arith.constant 0 : i32
    %c0_i32_0 = arith.constant 0 : i32
    %c0_i32_1 = arith.constant 0 : i32
    return %arg0, %c0_i32, %c0_i32_0 : i32, i32, i32
  }
}

</mosaic_0001>

<bundles_post_ra>
// kernel: tpu_custom_call.1
= control target key start
LH: loop header
LB: loop body
LE: loop exit
PB: predicated region body
PF: predicated region fallthrough
CT: control target
= control target key end

     0   :  { %13 = vsyncpa [#allocation9], 0  ;;  %s500_s0 = inlined_call_operand.hbm [shape: f32[2,8,128], index: 0, kind: input, shape index: {}]   ;;  %s501_s1 = inlined_call_operand.hbm [shape: f32[2,8,128], index: 1, kind: input, shape index: {}]   ;;  %s502_s2 = inlined_call_operand.vmem [shape: f32[1,2,1], index: 2, kind: output, shape index: {0}]   ;;  %s503_s3 = inlined_call_operand.vmem [shape: f32[1,2,1], index: 3, kind: output, shape index: {1}]   ;;  %s504_s4 = inlined_call_operand.vmem [shape: f32[1,2,1], index: 4, kind: output, shape index: {2}]   ;;  %s505_s5 = inlined_call_operand.vmem [shape: f32[1,2,1], index: 5, kind: output, shape index: {3}]   ;;  %s506_s6 = inlined_call_operand.vmem [shape: f32[1,2,1], index: 6, kind: output, shape index: {4}]   ;;  %s507_s7 = inlined_call_operand.vmem [shape: f32[1,2,1], index: 7, kind: output, shape index: {5}]  }
   0x1   :  { %14 = vsyncpa [#allocation11], 0  ;;  %s370_s24 = smov [#allocation8]   ;;  %s322_s28 = scalar_lea.hbm %s500_s0, 256 }
   0x2   :  { %s25_s25 = sshll.u32 %s370_s24, 4  ;;  %p323_p0 = scmp.ne.s32.totalorder %s500_s0, %s322_s28  ;;  %s26_s25 = int_to_ptr.vmem [resolvable:$true] %s25_s25 }
   0x3   :  { %p326_p1 = scmp.lt.u32.totalorder %s322_s28, %s500_s0 }
   0x5   :  { %p328_p2 = pnand %p326_p1, %p323_p0 }
   0x7   :  { %331 = shalt.err (!%p328_p2)
}
   0x8   :  { %s332_s10 = scalar_lea.vmem %s26_s25, 256  ;;  %p337_p4 = scmp.lt.s32.totalorder %s26_s25, %s26_s25 }
   0x9   :  { %p333_p3 = scmp.ne.s32.totalorder %s26_s25, %s332_s10  ;;  %p338_p5 = scmp.lt.s32.totalorder %s332_s10, %s332_s10 }
   0xb   :  { %p339_p6 = por %p338_p5, %p337_p4 }
   0xd   :  { %p340_p7 = pnand %p339_p6, %p333_p3 }
   0xf   :  { %343 = shalt.err (!%p340_p7)
}
  0x10   :  { %s371_s11 = smov 128   ;;  %s372_s12 = smov 8  }
  0x11   :  { %31 = dma.hbm_to_vmem [thread:$0]  %s500_s0, 256, %s26_s25, [#allocation9], %s371_s11, %s371_s11, %s372_s12  }
  0x12   :  { %s373_s15 = smov [#allocation10]   ;;  %s344_s19 = scalar_lea.hbm %s501_s1, 256 }
  0x13   :  { %s42_s16 = sshll.u32 %s373_s15, 4  ;;  %p345_p8 = scmp.ne.s32.totalorder %s501_s1, %s344_s19  ;;  %s43_s16 = int_to_ptr.vmem [resolvable:$true] %s42_s16 }
  0x14   :  { %p348_p9 = scmp.lt.u32.totalorder %s344_s19, %s501_s1 }
  0x16   :  { %p350_p10 = pnand %p348_p9, %p345_p8 }
  0x18   :  { %353 = shalt.err (!%p350_p10)
}
  0x19   :  { %s354_s24 = scalar_lea.vmem %s43_s16, 256  ;;  %p359_p12 = scmp.lt.s32.totalorder %s43_s16, %s43_s16 }
  0x1a   :  { %p355_p11 = scmp.ne.s32.totalorder %s43_s16, %s354_s24  ;;  %p360_p13 = scmp.lt.s32.totalorder %s354_s24, %s354_s24 }
  0x1c   :  { %p361_p0 = por %p360_p13, %p359_p12 }
  0x1e   :  { %p362_p1 = pnand %p361_p0, %p355_p11 }
  0x20   :  { %365 = shalt.err (!%p362_p1)
}
  0x21   :  { %48 = dma.hbm_to_vmem [thread:$0]  %s501_s1, 256, %s43_s16, [#allocation11], %s371_s11, %s371_s11, %s372_s12  }
  0x22   :  { %366 = dma.done.wait [#allocation9], 256  }
  0x23   :  { %367 = vsyncadd [#allocation9], 4294967040 }
  0x24   :  { %368 = dma.done.wait [#allocation11], 256  }
  0x25   :  { %369 = vsyncadd [#allocation11], 4294967040  ;;  %v438_v0 = vld [vmem:[#allocation8] sm:$0xff]  ;;  %v440_v1 = vld [vmem:[#allocation8 + $0x8] sm:$0xff]  ;;  %vm169_vm0 = vcmask 1041409   ;;  %vm172_vm1 = vcmask 1041408  }
  0x26   :  { %v442_v2 = vld [vmem:[#allocation10] sm:$0xff]  ;;  %v155_v3 = vrot.slane %v438_v0, 4  ;;  %v161_v4 = vrot.slane %v440_v1, 4  ;;  %v446_v5 = vld [vmem:[#allocation10 + $0x8] sm:$0xff]  ;;  %v102_v10 = vmul.f32 %v438_v0, %v438_v0  ;;  %v103_v11 = vmul.f32 %v440_v1, %v440_v1 }
  0x27   :  { %v98_v6 = vmul.f32 %v442_v2, %v438_v0  ;;  %v180_v7 = vrot.slane %v442_v2, 4  ;;  %v99_v8 = vmul.f32 %v446_v5, %v440_v1  ;;  %v186_v9 = vrot.slane %v446_v5, 4 }
  0x28   :  { %v156_v12 = vadd.f32 %v155_v3, %v438_v0  ;;  %v162_v13 = vadd.f32 %v161_v4, %v440_v1  ;;  %v224_v18 = vrot.slane %v102_v10, 4  ;;  %v230_v19 = vrot.slane %v103_v11, 4 }
  0x29   :  { %v202_v14 = vrot.slane %v98_v6, 4  ;;  %v181_v15 = vadd.f32 %v180_v7, %v442_v2  ;;  %v208_v16 = vrot.slane %v99_v8, 4  ;;  %v187_v17 = vadd.f32 %v186_v9, %v446_v5 }
  0x2a   :  { %v157_v20 = vrot.slane %v156_v12, 2  ;;  %v163_v21 = vrot.slane %v162_v13, 2  ;;  %v225_v26 = vadd.f32 %v224_v18, %v102_v10  ;;  %v231_v27 = vadd.f32 %v230_v19, %v103_v11 }
  0x2b   :  { %v203_v22 = vadd.f32 %v202_v14, %v98_v6  ;;  %v182_v23 = vrot.slane %v181_v15, 2  ;;  %v209_v24 = vadd.f32 %v208_v16, %v99_v8  ;;  %v188_v25 = vrot.slane %v187_v17, 2 }
  0x2c   :  { %v158_v28 = vadd.f32 %v157_v20, %v156_v12  ;;  %v164_v29 = vadd.f32 %v163_v21, %v162_v13  ;;  %v226_v34 = vrot.slane %v225_v26, 2  ;;  %v232_v35 = vrot.slane %v231_v27, 2 }
  0x2d   :  { %v204_v30 = vrot.slane %v203_v22, 2  ;;  %v183_v31 = vadd.f32 %v182_v23, %v181_v15  ;;  %v210_v32 = vrot.slane %v209_v24, 2  ;;  %v189_v33 = vadd.f32 %v188_v25, %v187_v17 }
  0x2e   :  { %v159_v36 = vrot.slane %v158_v28, 1  ;;  %v165_v37 = vrot.slane %v164_v29, 1  ;;  %v227_v42 = vadd.f32 %v226_v34, %v225_v26  ;;  %v233_v43 = vadd.f32 %v232_v35, %v231_v27 }
  0x2f   :  { %v205_v38 = vadd.f32 %v204_v30, %v203_v22  ;;  %v184_v39 = vrot.slane %v183_v31, 1  ;;  %v211_v40 = vadd.f32 %v210_v32, %v209_v24  ;;  %v190_v41 = vrot.slane %v189_v33, 1 }
  0x30   :  { %v160_v44 = vadd.f32 %v159_v36, %v158_v28  ;;  %v166_v45 = vadd.f32 %v165_v37, %v164_v29  ;;  %v228_v50 = vrot.slane %v227_v42, 1  ;;  %v234_v51 = vrot.slane %v233_v43, 1 }
  0x31   :  { %v206_v46 = vrot.slane %v205_v38, 1  ;;  %v185_v47 = vadd.f32 %v184_v39, %v183_v31  ;;  %v212_v48 = vrot.slane %v211_v40, 1  ;;  %v191_v49 = vadd.f32 %v190_v41, %v189_v33 }
  0x32   :  { %v170_v52 = vsel %vm169_vm0, %v166_v45, %v160_v44  ;;  %v106_v54 = vmul.f32 %v442_v2, %v442_v2  ;;  %v107_v55 = vmul.f32 %v446_v5, %v446_v5  ;;  %v229_v59 = vadd.f32 %v228_v50, %v227_v42 }
  0x33   :  { %v207_v53 = vadd.f32 %v206_v46, %v205_v38  ;;  %v173_v56 = vsel %vm172_vm1, %v170_v52, 0.0  ;;  %v213_v57 = vadd.f32 %v212_v48, %v211_v40  ;;  %v194_v58 = vsel %vm169_vm0, %v191_v49, %v185_v47 }
  0x34   :  { %174 = vadd.xlane.f32.xlu0 %v173_v56  ;;  %v235_v60 = vadd.f32 %v234_v51, %v233_v43  ;;  %v246_v61 = vrot.slane %v106_v54, 4  ;;  %v252_v62 = vrot.slane %v107_v55, 4  ;;  %v196_v3 = vsel %vm172_vm1, %v194_v58, 0.0 }
  0x35   :  { %v216_v63 = vsel %vm169_vm0, %v213_v57, %v207_v53  ;;  %v92_v4 = vsub.f32 %v438_v0, %v442_v2  ;;  %v93_v6 = vsub.f32 %v440_v1, %v446_v5  ;;  %vm176_vm2 = vcmask 1024  }
  0x36   :  { %v218_v7 = vsel %vm172_vm1, %v216_v63, 0.0  ;;  %v238_v8 = vsel %vm169_vm0, %v235_v60, %v229_v59  ;;  %v247_v9 = vadd.f32 %v246_v61, %v106_v54  ;;  %v253_v10 = vadd.f32 %v252_v62, %v107_v55 }
  0x37   :  { %219 = vadd.xlane.f32.xlu1 %v218_v7  ;;  %v110_v11 = vmul.f32 %v92_v4, %v92_v4  ;;  %v111_v12 = vmul.f32 %v93_v6, %v93_v6  ;;  %v240_v13 = vsel %vm172_vm1, %v238_v8, 0.0 }
  0x38   :  { %197 = vadd.xlane.f32.xlu0 %v196_v3  ;;  %v248_v14 = vrot.slane %v247_v9, 2  ;;  %v254_v15 = vrot.slane %v253_v10, 2 }
  0x39   :  { %v268_v16 = vrot.slane %v110_v11, 4  ;;  %v274_v17 = vrot.slane %v111_v12, 4 }
  0x3a   :  { %v249_v0 = vadd.f32 %v248_v14, %v247_v9  ;;  %v255_v2 = vadd.f32 %v254_v15, %v253_v10 }
  0x3b   :  { %241 = vadd.xlane.f32.xlu1 %v240_v13  ;;  %v269_v1 = vadd.f32 %v268_v16, %v110_v11  ;;  %v275_v5 = vadd.f32 %v274_v17, %v111_v12 }
  0x3c   :  { %v250_v18 = vrot.slane %v249_v0, 1  ;;  %v256_v19 = vrot.slane %v255_v2, 1 }
  0x3d   :  { %v270_v20 = vrot.slane %v269_v1, 2  ;;  %v276_v21 = vrot.slane %v275_v5, 2 }
  0x3e   :  { %v251_v22 = vadd.f32 %v250_v18, %v249_v0  ;;  %v257_v23 = vadd.f32 %v256_v19, %v255_v2 }
  0x3f   :  { %v271_v24 = vadd.f32 %v270_v20, %v269_v1  ;;  %v277_v25 = vadd.f32 %v276_v21, %v275_v5 }
  0x40   :  { %v260_v26 = vsel %vm169_vm0, %v257_v23, %v251_v22 }
  0x41   :  { %v262_v27 = vsel %vm172_vm1, %v260_v26, 0.0  ;;  %v272_v28 = vrot.slane %v271_v24, 1  ;;  %v278_v29 = vrot.slane %v277_v25, 1 }
  0x42   :  { %263 = vadd.xlane.f32.xlu0 %v262_v27 }
  0x43   :  { %v273_v30 = vadd.f32 %v272_v28, %v271_v24  ;;  %v279_v31 = vadd.f32 %v278_v29, %v277_v25 }
  0x45   :  { %v282_v32 = vsel %vm169_vm0, %v279_v31, %v273_v30 }
  0x46   :  { %v284_v33 = vsel %vm172_vm1, %v282_v32, 0.0 }
  0x47   :  { %285 = vadd.xlane.f32.xlu1 %v284_v33 }
  0xc1   :  { %v175_v34 = vpop.xlane.xlu0 %174 }
  0xc2   :  { %177 = vst.msk [vmem:[%s502_s2] sm:$0x3] %vm176_vm2, %v175_v34 }
  0xc4   :  { %v220_v35 = vpop.xlane.xlu1 %219 }
  0xc5   :  { %221 = vst.msk [vmem:[%s504_s4] sm:$0x3] %vm176_vm2, %v220_v35  ;;  %v198_v36 = vpop.xlane.xlu0 %197 }
  0xc6   :  { %199 = vst.msk [vmem:[%s503_s3] sm:$0x3] %vm176_vm2, %v198_v36 }
  0xc8   :  { %v242_v37 = vpop.xlane.xlu1 %241 }
  0xc9   :  { %243 = vst.msk [vmem:[%s505_s5] sm:$0x3] %vm176_vm2, %v242_v37 }
  0xcf   :  { %v264_v38 = vpop.xlane.xlu0 %263 }
  0xd0   :  { %265 = vst.msk [vmem:[%s506_s6] sm:$0x3] %vm176_vm2, %v264_v38 }
  0xd4   :  { %v286_v39 = vpop.xlane.xlu1 %285 }
  0xd5   :  { %287 = vst.msk [vmem:[%s507_s7] sm:$0x3] %vm176_vm2, %v286_v39 }
  0xd6   :  { %312 = vsyncpa [#allocation9], 1 }
  0xd7   :  { %313 = vsyncpa [#allocation11], 1 }

</bundles_post_ra>
